<compile_context>
chip_gen: v7x
topology: tpu7x:2x2x1
jax: 0.10.0
libtpu: 0.0.40
codegen_flags: <defaults>
</compile_context>

<pallas_src>
import functools

import jax
import jax.numpy as jnp
from jax.experimental import pallas as pl
from jax.experimental.pallas import tpu as pltpu

OUT_DIM = 54      # 6 * 9
OUT_PAD = 128     # lane-dense padded output width (cols >= 54 are exact zeros)


def _choose_point_tile(n):
    """Point-tile size: a multiple of 128 that divides N (so max-pool segments
    never straddle a grid block), falling back to the full point axis."""
    if n <= 512:
        return n
    for t in (512, 256, 128):
        if n % t == 0:
            return t
    return n


# ----------------------------------------------------------------------------
# Fused kernel: per-tile encoder + running max-pool + per-batch-row regressor
# ----------------------------------------------------------------------------
def fused_kernel(x_ref, w1_ref, b1_ref, w2_ref, b2_ref,
                 w3_ref, b3_ref, w4_ref, b4_ref, out_ref, feats_ref, *, F):
    """Grid = (B, 2 clouds, N // TN point tiles); last axis fastest.

    x_ref  : (TN, 3)    point tile of cloud c of batch b (native layout)
    w1_ref : (3, 32)    b1_ref: (1, 32)
    w2_ref : (32, F)    b2_ref: (1, F)
    w3_ref : (2F, 256)  b3_ref: (1, 256)
    w4_ref : (256, 128) b4_ref: (1, 128)   (zero-padded from 54 -> 128 lanes)
    out_ref: (1, 128)   lane-dense padded output row for batch b
    feats_ref (scratch): (2, F) running per-cloud max features for current b
    """
    c = pl.program_id(1)
    t = pl.program_id(2)

    # ---- init running-max accumulator for this batch row --------------------
    @pl.when(jnp.logical_and(c == 0, t == 0))
    def _init():
        # -inf, NOT 0: conv2 has no ReLU, features can be negative.
        feats_ref[...] = jnp.full(feats_ref.shape, -jnp.inf, dtype=feats_ref.dtype)

    # ---- encoder on this point tile -----------------------------------------
    x = x_ref[...]                                   # (TN, 3)
    w1 = w1_ref[...]                                 # (3, 32)
    # K=3 layer as 3 VPU broadcast-FMAs (skips a wasted MXU pass).
    h = (x[:, 0:1] * w1[0:1, :]
         + x[:, 1:2] * w1[1:2, :]
         + x[:, 2:3] * w1[2:3, :]
         + b1_ref[...])
    h = jnp.maximum(h, 0.0)                          # ReLU(conv1), (TN, 32)
    y = jnp.dot(h, w2_ref[...],
                preferred_element_type=jnp.float32) + b2_ref[...]   # conv2, no ReLU
    tile_max = jnp.max(y, axis=0, keepdims=True)     # (1, F) max over tile points

    prev = feats_ref[pl.ds(c, 1), :]                 # running max for cloud c
    feats_ref[pl.ds(c, 1), :] = jnp.maximum(prev, tile_max)

    # ---- regressor head: once per batch row, after both clouds are pooled ---
    @pl.when(jnp.logical_and(c == 1, t == pl.num_programs(2) - 1))
    def _epilogue():
        f1 = feats_ref[0:1, :]                       # (1, F)
        f2 = feats_ref[1:2, :]                       # (1, F)
        # cat([f1, f2]) @ W3 == f1 @ W3[:F] + f2 @ W3[F:]
        h2 = (jnp.dot(f1, w3_ref[:F, :], preferred_element_type=jnp.float32)
              + jnp.dot(f2, w3_ref[F:, :], preferred_element_type=jnp.float32)
              + b3_ref[...])
        h2 = jnp.maximum(h2, 0.0)                    # (1, 256)
        o = jnp.dot(h2, w4_ref[...], preferred_element_type=jnp.float32)
        out_ref[...] = o + b4_ref[...]               # (1, 128), lanes >= 54 are 0


# ----------------------------------------------------------------------------
# Wrapper
# ----------------------------------------------------------------------------
@jax.jit
def rope_to_joint_regressor(rope_input, kparams):
    """rope_input: (B, 2, N, 3); kparams: output of prepare_params()."""
    B, two, N, D = rope_input.shape
    assert two == 2 and D == 3
    F = kparams["w2"].shape[1]

    x = rope_input.astype(jnp.float32)               # native layout, no transpose
    TN = _choose_point_tile(N)
    NT = N // TN

    grid = (B, 2, NT)
    # Weights/biases: constant index_maps -> DMA'd once, resident in VMEM.
    in_specs = [
        pl.BlockSpec((None, None, TN, 3), lambda b, c, t: (b, c, t, 0)),  # x tile
        pl.BlockSpec((3, 32),        lambda b, c, t: (0, 0)),             # w1
        pl.BlockSpec((1, 32),        lambda b, c, t: (0, 0)),             # b1
        pl.BlockSpec((32, F),        lambda b, c, t: (0, 0)),             # w2
        pl.BlockSpec((1, F),         lambda b, c, t: (0, 0)),             # b2
        pl.BlockSpec((2 * F, 256),   lambda b, c, t: (0, 0)),             # w3
        pl.BlockSpec((1, 256),       lambda b, c, t: (0, 0)),             # b3
        pl.BlockSpec((256, OUT_PAD), lambda b, c, t: (0, 0)),             # w4 (padded)
        pl.BlockSpec((1, OUT_PAD),   lambda b, c, t: (0, 0)),             # b4 (padded)
    ]
    out_specs = pl.BlockSpec((None, 1, OUT_PAD), lambda b, c, t: (b, 0, 0))

    out_padded = pl.pallas_call(
        functools.partial(fused_kernel, F=F),
        out_shape=jax.ShapeDtypeStruct((B, 1, OUT_PAD), jnp.float32),
        grid_spec=pltpu.PrefetchScalarGridSpec(
            num_scalar_prefetch=0,
            grid=grid,
            in_specs=in_specs,
            out_specs=out_specs,
            scratch_shapes=[pltpu.VMEM((2, F), jnp.float32)],
        ),
        compiler_params=pltpu.CompilerParams(
            # batch rows are fully independent (epilogue is per-row) -> parallel;
            # cloud / point axes carry the running-max accumulator -> arbitrary.
            dimension_semantics=("parallel", "arbitrary", "arbitrary"),
            vmem_limit_bytes=32 * 1024 * 1024,
        ),
    )(x,
      kparams["w1"], kparams["b1"], kparams["w2"], kparams["b2"],
      kparams["w3"], kparams["b3"], kparams["w4p"], kparams["b4p"])

    return out_padded[:, 0, :OUT_DIM].reshape(-1, 6, 9)


# ----------------------------------------------------------------------------
# One-time parameter prep (hoisted out of the per-call jitted forward)
# ----------------------------------------------------------------------------
def prepare_params(params):
    kp = {k: jnp.asarray(params[k], jnp.float32)
          for k in ("w1", "b1", "w2", "b2", "w3", "b3")}
    kp["w4p"] = jnp.pad(jnp.asarray(params["w4"], jnp.float32),
                        ((0, 0), (0, OUT_PAD - OUT_DIM)))
    kp["b4p"] = jnp.pad(jnp.asarray(params["b4"], jnp.float32),
                        ((0, 0), (0, OUT_PAD - OUT_DIM)))
    return kp


# ----------------------------------------------------------------------------
# Deterministic parameter init (PyTorch default uniform init shapes, (in, out))
# ----------------------------------------------------------------------------
def init_params(key, feat_size=128):
    ks = jax.random.split(key, 8)

    def u(k, shape, fan_in):
        bound = 1.0 / jnp.sqrt(float(fan_in))
        return jax.random.uniform(k, shape, jnp.float32, -bound, bound)

    return {
        # encoder: Conv1d(3,32,1) / Conv1d(32,feat_size,1) stored as (in, out)
        "w1": u(ks[0], (3, 32), 3),
        "b1": u(ks[1], (1, 32), 3),
        "w2": u(ks[2], (32, feat_size), 32),
        "b2": u(ks[3], (1, feat_size), 32),
        # regressor: Linear(2F,256) / Linear(256,54) stored as (in, out)
        "w3": u(ks[4], (2 * feat_size, 256), 2 * feat_size),
        "b3": u(ks[5], (1, 256), 2 * feat_size),
        "w4": u(ks[6], (256, OUT_DIM), 256),
        "b4": u(ks[7], (1, OUT_DIM), 256),
    }


# ----------------------------------------------------------------------------
# Pure-JAX reference (matches the PyTorch module; conv2 has no ReLU)
# ----------------------------------------------------------------------------
def reference_forward(rope_input, params):
    pc1 = rope_input[:, 0].astype(jnp.float32)   # (B, N, 3)
    pc2 = rope_input[:, 1].astype(jnp.float32)

    def encode(pc):
        h = jnp.maximum(pc @ params["w1"] + params["b1"], 0.0)
        y = h @ params["w2"] + params["b2"]
        return jnp.max(y, axis=1)                # (B, F)

    combined = jnp.concatenate([encode(pc1), encode(pc2)], axis=1)
    h2 = jnp.maximum(combined @ params["w3"] + params["b3"], 0.0)
    out = h2 @ params["w4"] + params["b4"]
    return out.reshape(-1, 6, 9)


if __name__ == "__main__":
    key = jax.random.PRNGKey(0)
    k_in, k_par = jax.random.split(key)

    B, N, FEAT = 2, 64, 128
    rope_input = jax.random.normal(k_in, (B, 2, N, 3), dtype=jnp.float32)
    params = init_params(k_par, feat_size=FEAT)
    kparams = prepare_params(params)             # one-time weight prep

    out = rope_to_joint_regressor(rope_input, kparams)
    out = jax.block_until_ready(out)

    ref = reference_forward(rope_input, params)
    assert out.shape == (B, 6, 9), out.shape
    assert jnp.allclose(out, ref, atol=1e-4, rtol=1e-4), "mismatch vs reference"

    print("KERNEL_OK")
</pallas_src>

<mosaic_0001>
module attributes {stable_mosaic.version = 11 : i64} {
  func.func @fused_kernel(%arg0: i32, %arg1: i32, %arg2: i32, %arg3: memref<1x1x64x3xf32, #tpu.memory_space<vmem>>, %arg4: memref<3x32xf32, #tpu.memory_space<vmem>>, %arg5: memref<1x32xf32, #tpu.memory_space<vmem>>, %arg6: memref<32x128xf32, #tpu.memory_space<vmem>>, %arg7: memref<1x128xf32, #tpu.memory_space<vmem>>, %arg8: memref<256x256xf32, #tpu.memory_space<vmem>>, %arg9: memref<1x256xf32, #tpu.memory_space<vmem>>, %arg10: memref<256x128xf32, #tpu.memory_space<vmem>>, %arg11: memref<1x128xf32, #tpu.memory_space<vmem>>, %arg12: memref<1x1x128xf32, #tpu.memory_space<vmem>>, %arg13: memref<2x128xf32, #tpu.memory_space<vmem>>) attributes {dimension_semantics = [#tpu.dimension_semantics<parallel>, #tpu.dimension_semantics<arbitrary>, #tpu.dimension_semantics<arbitrary>], iteration_bounds = array<i64: 2, 2, 1>, scalar_prefetch = 0 : i64, scratch_operands = 1 : i64, tpu.core_type = #tpu.core_type<tc>, window_params = [{transform_indices = @transform_0, window_bounds = array<i64: 1, 1, 64, 3>}, {pipeline_mode = #tpu.pipeline_mode<synchronous>, transform_indices = @transform_1, window_bounds = array<i64: 3, 32>}, {pipeline_mode = #tpu.pipeline_mode<synchronous>, transform_indices = @transform_2, window_bounds = array<i64: 1, 32>}, {pipeline_mode = #tpu.pipeline_mode<synchronous>, transform_indices = @transform_3, window_bounds = array<i64: 32, 128>}, {pipeline_mode = #tpu.pipeline_mode<synchronous>, transform_indices = @transform_4, window_bounds = array<i64: 1, 128>}, {pipeline_mode = #tpu.pipeline_mode<synchronous>, transform_indices = @transform_5, window_bounds = array<i64: 256, 256>}, {pipeline_mode = #tpu.pipeline_mode<synchronous>, transform_indices = @transform_6, window_bounds = array<i64: 1, 256>}, {pipeline_mode = #tpu.pipeline_mode<synchronous>, transform_indices = @transform_7, window_bounds = array<i64: 256, 128>}, {pipeline_mode = #tpu.pipeline_mode<synchronous>, transform_indices = @transform_8, window_bounds = array<i64: 1, 128>}, {transform_indices = @transform_9, window_bounds = array<i64: 1, 1, 128>}]} {
    %c0_i32 = arith.constant 0 : i32
    %0 = arith.cmpi eq, %arg1, %c0_i32 : i32
    %c0_i32_0 = arith.constant 0 : i32
    %1 = arith.cmpi eq, %arg2, %c0_i32_0 : i32
    %2 = arith.andi %0, %1 : i1
    %3 = arith.extui %2 : i1 to i32
    %c0_i32_1 = arith.constant 0 : i32
    %4 = arith.cmpi ne, %3, %c0_i32_1 : i32
    scf.if %4 {
      %cst_19 = arith.constant 0xFF800000 : f32
      %47 = vector.broadcast %cst_19 : f32 to vector<2x128xf32>
      %c0_20 = arith.constant 0 : index
      %c0_21 = arith.constant 0 : index
      %48 = vector.load %arg13[%c0_20, %c0_21] : memref<2x128xf32, #tpu.memory_space<vmem>>, vector<2x128xf32>
      tpu.vector_store %arg13[%c0_20, %c0_21], %47 {strides = array<i32>} : memref<2x128xf32, #tpu.memory_space<vmem>>, vector<2x128xf32>,
    } else {
    }
    %c0 = arith.constant 0 : index
    %c0_2 = arith.constant 0 : index
    %c0_3 = arith.constant 0 : index
    %c0_4 = arith.constant 0 : index
    %5 = vector.load %arg3[%c0, %c0_2, %c0_3, %c0_4] : memref<1x1x64x3xf32, #tpu.memory_space<vmem>>, vector<1x1x64x3xf32>
    %6 = vector.shape_cast %5 : vector<1x1x64x3xf32> to vector<64x3xf32>
    %c0_5 = arith.constant 0 : index
    %c0_6 = arith.constant 0 : index
    %7 = vector.load %arg4[%c0_5, %c0_6] : memref<3x32xf32, #tpu.memory_space<vmem>>, vector<3x32xf32>
    %8 = vector.extract_strided_slice %6 {offsets = [0, 0], sizes = [64, 1], strides = [1, 1]} : vector<64x3xf32> to vector<64x1xf32>
    %9 = vector.extract_strided_slice %7 {offsets = [0, 0], sizes = [1, 32], strides = [1, 1]} : vector<3x32xf32> to vector<1x32xf32>
    %10 = vector.broadcast %8 : vector<64x1xf32> to vector<64x32xf32>
    %11 = vector.broadcast %9 : vector<1x32xf32> to vector<64x32xf32>
    %12 = arith.mulf %10, %11 : vector<64x32xf32>
    %13 = vector.extract_strided_slice %6 {offsets = [0, 1], sizes = [64, 1], strides = [1, 1]} : vector<64x3xf32> to vector<64x1xf32>
    %14 = vector.extract_strided_slice %7 {offsets = [1, 0], sizes = [1, 32], strides = [1, 1]} : vector<3x32xf32> to vector<1x32xf32>
    %15 = vector.broadcast %13 : vector<64x1xf32> to vector<64x32xf32>
    %16 = vector.broadcast %14 : vector<1x32xf32> to vector<64x32xf32>
    %17 = arith.mulf %15, %16 : vector<64x32xf32>
    %18 = arith.addf %12, %17 : vector<64x32xf32>
    %19 = vector.extract_strided_slice %6 {offsets = [0, 2], sizes = [64, 1], strides = [1, 1]} : vector<64x3xf32> to vector<64x1xf32>
    %20 = vector.extract_strided_slice %7 {offsets = [2, 0], sizes = [1, 32], strides = [1, 1]} : vector<3x32xf32> to vector<1x32xf32>
    %21 = vector.broadcast %19 : vector<64x1xf32> to vector<64x32xf32>
    %22 = vector.broadcast %20 : vector<1x32xf32> to vector<64x32xf32>
    %23 = arith.mulf %21, %22 : vector<64x32xf32>
    %24 = arith.addf %18, %23 : vector<64x32xf32>
    %c0_7 = arith.constant 0 : index
    %c0_8 = arith.constant 0 : index
    %25 = vector.load %arg5[%c0_7, %c0_8] : memref<1x32xf32, #tpu.memory_space<vmem>>, vector<1x32xf32>
    %26 = vector.broadcast %25 : vector<1x32xf32> to vector<64x32xf32>
    %27 = arith.addf %24, %26 : vector<64x32xf32>
    %cst = arith.constant 0.000000e+00 : f32
    %28 = vector.broadcast %cst : f32 to vector<64x32xf32>
    %29 = arith.maximumf %27, %28 : vector<64x32xf32>
    %c0_9 = arith.constant 0 : index
    %c0_10 = arith.constant 0 : index
    %30 = vector.load %arg6[%c0_9, %c0_10] : memref<32x128xf32, #tpu.memory_space<vmem>>, vector<32x128xf32>
    %cst_11 = arith.constant dense<0.000000e+00> : vector<64x128xf32>
    %31 = tpu.matmul %29, %30, %cst_11 {dimension_numbers = #tpu.dot_dimension_numbers<[1], [0], [0], [1], [0, 0, 1, 1], [], []>} : vector<64x32xf32>, vector<32x128xf32>, vector<64x128xf32> -> vector<64x128xf32>
    %c0_12 = arith.constant 0 : index
    %c0_13 = arith.constant 0 : index
    %32 = vector.load %arg7[%c0_12, %c0_13] : memref<1x128xf32, #tpu.memory_space<vmem>>, vector<1x128xf32>
    %33 = vector.broadcast %32 : vector<1x128xf32> to vector<64x128xf32>
    %34 = arith.addf %31, %33 : vector<64x128xf32>
    %cst_14 = arith.constant dense<0xFF800000> : vector<128xf32>
    %35 = vector.multi_reduction <maximumf>, %34, %cst_14 [0] : vector<64x128xf32> to vector<128xf32>
    %36 = vector.shape_cast %35 : vector<128xf32> to vector<1x128xf32>
    %37 = arith.index_cast %arg1 : i32 to index
    %c0_15 = arith.constant 0 : index
    %38 = vector.load %arg13[%37, %c0_15] : memref<2x128xf32, #tpu.memory_space<vmem>>, vector<1x128xf32>
    %39 = arith.maximumf %38, %36 : vector<1x128xf32>
    %40 = arith.index_cast %arg1 : i32 to index
    %c0_16 = arith.constant 0 : index
    %41 = vector.load %arg13[%40, %c0_16] : memref<2x128xf32, #tpu.memory_space<vmem>>, vector<1x128xf32>
    tpu.vector_store %arg13[%40, %c0_16], %39 {strides = array<i32>} : memref<2x128xf32, #tpu.memory_space<vmem>>, vector<1x128xf32>,
    %c1_i32 = arith.constant 1 : i32
    %42 = arith.cmpi eq, %arg1, %c1_i32 : i32
    %c0_i32_17 = arith.constant 0 : i32
    %43 = arith.cmpi eq, %arg2, %c0_i32_17 : i32
    %44 = arith.andi %42, %43 : i1
    %45 = arith.extui %44 : i1 to i32
    %c0_i32_18 = arith.constant 0 : i32
    %46 = arith.cmpi ne, %45, %c0_i32_18 : i32
    scf.if %46 {
      %c0_19 = arith.constant 0 : index
      %c0_20 = arith.constant 0 : index
      %47 = vector.load %arg13[%c0_19, %c0_20] : memref<2x128xf32, #tpu.memory_space<vmem>>, vector<1x128xf32>
      %c1 = arith.constant 1 : index
      %c0_21 = arith.constant 0 : index
      %48 = vector.load %arg13[%c1, %c0_21] : memref<2x128xf32, #tpu.memory_space<vmem>>, vector<1x128xf32>
      %c0_22 = arith.constant 0 : index
      %c0_23 = arith.constant 0 : index
      %49 = vector.load %arg8[%c0_22, %c0_23] : memref<256x256xf32, #tpu.memory_space<vmem>>, vector<128x256xf32>
      %cst_24 = arith.constant dense<0.000000e+00> : vector<1x256xf32>
      %50 = tpu.matmul %47, %49, %cst_24 {dimension_numbers = #tpu.dot_dimension_numbers<[1], [0], [0], [1], [0, 0, 1, 1], [], []>} : vector<1x128xf32>, vector<128x256xf32>, vector<1x256xf32> -> vector<1x256xf32>
      %c128 = arith.constant 128 : index
      %c0_25 = arith.constant 0 : index
      %51 = vector.load %arg8[%c128, %c0_25] : memref<256x256xf32, #tpu.memory_space<vmem>>, vector<128x256xf32>
      %cst_26 = arith.constant dense<0.000000e+00> : vector<1x256xf32>
      %52 = tpu.matmul %48, %51, %cst_26 {dimension_numbers = #tpu.dot_dimension_numbers<[1], [0], [0], [1], [0, 0, 1, 1], [], []>} : vector<1x128xf32>, vector<128x256xf32>, vector<1x256xf32> -> vector<1x256xf32>
      %53 = arith.addf %50, %52 : vector<1x256xf32>
      %c0_27 = arith.constant 0 : index
      %c0_28 = arith.constant 0 : index
      %54 = vector.load %arg9[%c0_27, %c0_28] : memref<1x256xf32, #tpu.memory_space<vmem>>, vector<1x256xf32>
      %55 = arith.addf %53, %54 : vector<1x256xf32>
      %cst_29 = arith.constant 0.000000e+00 : f32
      %56 = vector.broadcast %cst_29 : f32 to vector<1x256xf32>
      %57 = arith.maximumf %55, %56 : vector<1x256xf32>
      %c0_30 = arith.constant 0 : index
      %c0_31 = arith.constant 0 : index
      %58 = vector.load %arg10[%c0_30, %c0_31] : memref<256x128xf32, #tpu.memory_space<vmem>>, vector<256x128xf32>
      %cst_32 = arith.constant dense<0.000000e+00> : vector<1x128xf32>
      %59 = tpu.matmul %57, %58, %cst_32 {dimension_numbers = #tpu.dot_dimension_numbers<[1], [0], [0], [1], [0, 0, 1, 1], [], []>} : vector<1x256xf32>, vector<256x128xf32>, vector<1x128xf32> -> vector<1x128xf32>
      %c0_33 = arith.constant 0 : index
      %c0_34 = arith.constant 0 : index
      %60 = vector.load %arg11[%c0_33, %c0_34] : memref<1x128xf32, #tpu.memory_space<vmem>>, vector<1x128xf32>
      %61 = arith.addf %59, %60 : vector<1x128xf32>
      %c0_35 = arith.constant 0 : index
      %c0_36 = arith.constant 0 : index
      %c0_37 = arith.constant 0 : index
      %62 = vector.load %arg12[%c0_35, %c0_36, %c0_37] : memref<1x1x128xf32, #tpu.memory_space<vmem>>, vector<1x1x128xf32>
      %63 = vector.shape_cast %62 : vector<1x1x128xf32> to vector<1x128xf32>
      %64 = vector.shape_cast %61 : vector<1x128xf32> to vector<1x1x128xf32>
      tpu.vector_store %arg12[%c0_35, %c0_36, %c0_37], %64 {strides = array<i32>} : memref<1x1x128xf32, #tpu.memory_space<vmem>>, vector<1x1x128xf32>,
    } else {
    }
    return
  }
  func.func @transform_0(%arg0: i32, %arg1: i32, %arg2: i32) -> (i32, i32, i32, i32) {
    %c0_i32 = arith.constant 0 : i32
    %c0_i32_0 = arith.constant 0 : i32
    return %arg0, %arg1, %arg2, %c0_i32 : i32, i32, i32, i32
  }
  func.func @transform_1(%arg0: i32, %arg1: i32, %arg2: i32) -> (i32, i32) {
    %c0_i32 = arith.constant 0 : i32
    %c0_i32_0 = arith.constant 0 : i32
    %c0_i32_1 = arith.constant 0 : i32
    return %c0_i32, %c0_i32_0 : i32, i32
  }
  func.func @transform_2(%arg0: i32, %arg1: i32, %arg2: i32) -> (i32, i32) {
    %c0_i32 = arith.constant 0 : i32
    %c0_i32_0 = arith.constant 0 : i32
    %c0_i32_1 = arith.constant 0 : i32
    return %c0_i32, %c0_i32_0 : i32, i32
  }
  func.func @transform_3(%arg0: i32, %arg1: i32, %arg2: i32) -> (i32, i32) {
    %c0_i32 = arith.constant 0 : i32
    %c0_i32_0 = arith.constant 0 : i32
    %c0_i32_1 = arith.constant 0 : i32
    return %c0_i32, %c0_i32_0 : i32, i32
  }
  func.func @transform_4(%arg0: i32, %arg1: i32, %arg2: i32) -> (i32, i32) {
    %c0_i32 = arith.constant 0 : i32
    %c0_i32_0 = arith.constant 0 : i32
    %c0_i32_1 = arith.constant 0 : i32
    return %c0_i32, %c0_i32_0 : i32, i32
  }
  func.func @transform_5(%arg0: i32, %arg1: i32, %arg2: i32) -> (i32, i32) {
    %c0_i32 = arith.constant 0 : i32
    %c0_i32_0 = arith.constant 0 : i32
    %c0_i32_1 = arith.constant 0 : i32
    return %c0_i32, %c0_i32_0 : i32, i32
  }
  func.func @transform_6(%arg0: i32, %arg1: i32, %arg2: i32) -> (i32, i32) {
    %c0_i32 = arith.constant 0 : i32
    %c0_i32_0 = arith.constant 0 : i32
    %c0_i32_1 = arith.constant 0 : i32
    return %c0_i32, %c0_i32_0 : i32, i32
  }
  func.func @transform_7(%arg0: i32, %arg1: i32, %arg2: i32) -> (i32, i32) {
    %c0_i32 = arith.constant 0 : i32
    %c0_i32_0 = arith.constant 0 : i32
    %c0_i32_1 = arith.constant 0 : i32
    return %c0_i32, %c0_i32_0 : i32, i32
  }
  func.func @transform_8(%arg0: i32, %arg1: i32, %arg2: i32) -> (i32, i32) {
    %c0_i32 = arith.constant 0 : i32
    %c0_i32_0 = arith.constant 0 : i32
    %c0_i32_1 = arith.constant 0 : i32
    return %c0_i32, %c0_i32_0 : i32, i32
  }
  func.func @transform_9(%arg0: i32, %arg1: i32, %arg2: i32) -> (i32, i32, i32) {
    %c0_i32 = arith.constant 0 : i32
    %c0_i32_0 = arith.constant 0 : i32
    %c0_i32_1 = arith.constant 0 : i32
    return %arg0, %c0_i32, %c0_i32_0 : i32, i32, i32
  }
}

</mosaic_0001>

<bundles_post_ra>
// kernel: squeeze.1
= control target key start
LH: loop header
LB: loop body
LE: loop exit
PB: predicated region body
PF: predicated region fallthrough
CT: control target
= control target key end

     0   :  { %s50_s8 = smov 101   ;;  %vm7_vm0 = vcmask 72704   ;;  %s51_s11 = smov 110   ;;  %s91_s0 = inlined_call_operand.vmem [shape: f32[2,54], index: 0, kind: input, shape index: {}]   ;;  %s92_s1 = inlined_call_operand.vmem [shape: f32[2,6,9], index: 1, kind: output, shape index: {}]  }
   0x1   :  { %v4_v0 = vld [vmem:[%s91_s0] sm:$0x3]  ;;  %s49_s0 = smov 119   ;;  %s52_s12 = smov 92  }
   0x2   :  { %5 = vst [vmem:[#allocation0] sm:$0x3] %v4_v0  ;;  %s53_s13 = smov 83  }
   0x9   :  { %v9_v1 = vld [vmem:[#allocation0] sm:$0x3]  }
   0xa   :  { %v21_v2 = vld [vmem:[#allocation0] sm:$0x3]   ;;  %10 = vrot.lane.b32.xlu0 %v9_v1, %s49_s0 }
   0xb   :  { %22 = vrot.lane.b32.xlu1 %v21_v2, %s50_s8  ;;  %v6_v3 = vld [vmem:[#allocation0] sm:$0x3]  }
   0xc   :  { %v15_v4 = vld [vmem:[#allocation0] sm:$0x3]   ;;  %8 = vst.msk [vmem:[%s92_s1] ss:$8 sm:$0x3] %vm7_vm0, %v6_v3  }
   0xd   :  { %v27_v5 = vld [vmem:[#allocation0] sm:$0x3]  }
   0xe   :  { %16 = vrot.lane.b32.xlu0 %v15_v4, %s51_s11  ;;  %v33_v6 = vld [vmem:[#allocation0] sm:$0x3]  }
   0xf   :  { %28 = vrot.lane.b32.xlu1 %v27_v5, %s52_s12 }
  0x12   :  { %34 = vrot.lane.b32.xlu0 %v33_v6, %s53_s13 }
  0x7c   :  { %v11_v7 = vpop.permute.xlu0 %10  }
  0x7d   :  { %v23_v8 = vpop.permute.xlu1 %22   ;;  %39 = vst.msk [vmem:[%s92_s1 + $0x1] ss:$8 sm:$0x3] %vm7_vm0, %v11_v7  }
  0x7e   :  { %41 = vst.msk [vmem:[%s92_s1 + $0x3] ss:$8 sm:$0x3] %vm7_vm0, %v23_v8  }
  0x80   :  { %v17_v9 = vpop.permute.xlu0 %16  }
  0x81   :  { %v29_v10 = vpop.permute.xlu1 %28   ;;  %40 = vst.msk [vmem:[%s92_s1 + $0x2] ss:$8 sm:$0x3] %vm7_vm0, %v17_v9  }
  0x82   :  { %42 = vst.msk [vmem:[%s92_s1 + $0x4] ss:$8 sm:$0x3] %vm7_vm0, %v29_v10  }
  0x84   :  { %v35_v11 = vpop.permute.xlu0 %34  }
  0x85   :  { %43 = vst.msk [vmem:[%s92_s1 + $0x5] ss:$8 sm:$0x3] %vm7_vm0, %v35_v11  }

// kernel: rope_to_joint_regressor.1
= control target key start
LH: loop header
LB: loop body
LE: loop exit
PB: predicated region body
PF: predicated region fallthrough
CT: control target
= control target key end

     0   :  { %14 = vsyncpa [#allocation4], 0  ;;  %s1569_s30 = smov 0   ;;  %s1571_s10 = smov 0   ;;  %s1877_s0 = inlined_call_operand.vmem [shape: f32[2,2,64,3], index: 0, kind: input, shape index: {}]   ;;  %s1878_s1 = inlined_call_operand.vmem [shape: f32[3,32], index: 1, kind: input, shape index: {}]   ;;  %s1879_s2 = inlined_call_operand.vmem [shape: f32[1,32], index: 2, kind: input, shape index: {}]   ;;  %s1880_s3 = inlined_call_operand.vmem [shape: f32[32,128], index: 3, kind: input, shape index: {}]   ;;  %s1881_s4 = inlined_call_operand.vmem [shape: f32[1,128], index: 4, kind: input, shape index: {}]   ;;  %s1882_s5 = inlined_call_operand.hbm [shape: f32[256,256], index: 5, kind: input, shape index: {}]   ;;  %s1883_s6 = inlined_call_operand.vmem [shape: f32[1,256], index: 6, kind: input, shape index: {}]   ;;  %s1884_s7 = inlined_call_operand.vmem [shape: f32[256,128], index: 7, kind: input, shape index: {}]   ;;  %s1885_s8 = inlined_call_operand.vmem [shape: f32[1,128], index: 8, kind: input, shape index: {}]   ;;  %s1886_s9 = inlined_call_operand.vmem [shape: f32[2,1,128], index: 9, kind: output, shape index: {}]  }
   0x1   :  { %s1573_s11 = smov 0   ;;  %s1575_s12 = smov 0  }
   0x2   :  { %s1577_s13 = smov 0  }
   0x3 LB: > { %s1166_s14 = sadd.s32 4294967295, %s1509_s13   ;;  %s35_s15 = sadd.s32 1, %s1501_s11  ;;  %s1509_s13 = sphi %s1577_s13, %s20_s13   ;;  %s1505_s12 = sphi %s1575_s12, %s1898_s12   ;;  %s1501_s11 = sphi %s1573_s11, %s1897_s11   ;;  %s1497_s10 = sphi %s1571_s10, %s1896_s10   ;;  %s1493_s30 = sphi %s1569_s30, %s1895_s30  }
   0x4   : > { %p37_p0 = scmp.ge.s32.totalorder %s35_s15, 2  ;;  %s39_s16 = sadd.s32 1, %s1505_s12 }
   0x5   : > { %p1168_p1 = scmp.ge.s32.totalorder %s1509_s13, 1  ;;  %p268_p2 = scmp.lt.s32.totalorder %s1509_s13, 5 }
   0x6   : > { %s1900_s15 = smov (%p37_p0, %s35_s15), 0  ;;  %s1902_s16 = smov (!%p37_p0, %s39_s16), %s1505_s12 }
   0x7   : > { %p1602_p3 = pnand %p1168_p1, %p268_p2  ;;  %p41_p4 = scmp.ge.s32.totalorder %s1902_s16, 2 }
   0x8   : > { %p1606_p5 = scmp.eq.s32.totalorder %s1166_s14, 0  ;;  %s1511_s19 = smov [#allocation3]  }
   0x9   : > { %s1890_s17 = scalar_select %p1602_p3, 1, 0 }
   0xa   : > { %s1891_s18 = scalar_select %p1606_p5, 1, 0 }
   0xb   : > { %p1373_p6 = pneg %p1602_p3  ;;  %s1904_s16 = smov (%p41_p4, %s1902_s16), 0 }
   0xc   : > { %s292_s20 = sshll.u32 %s1511_s19, 4  ;;  %s1439_s24 = scalar_lea.hbm %s1882_s5, 8192  ;;  %s293_s20 = int_to_ptr.vmem [resolvable:$true] %s292_s20 }
   0xd   : > { %p1616_p7 = pnand %p1606_p5, %p1373_p6  ;;  %p1440_p8 = scmp.ne.s32.totalorder %s1882_s5, %s1439_s24 }
   0xe   : > { %p1446_p12 = scmp.lt.u32.totalorder %s1439_s24, %s1882_s5 }
   0xf   : > { %p1441_p9 = pneg %p1616_p7 }
  0x11   : > { %p1442_p10 = pnand %p1441_p9, %p1440_p8 }
  0x13   : > { %p1443_p11 = pneg %p1442_p10 }
  0x15   : > { %p1448_p13 = pnand %p1446_p12, %p1443_p11 }
  0x17   : > { %1451 = shalt.err (!%p1448_p13)
}
  0x18   : > { %s1452_s29 = scalar_lea.vmem %s293_s20, 8192  ;;  %p1460_p4 = scmp.lt.s32.totalorder %s293_s20, %s293_s20 }
  0x19   : > { %p1453_p0 = scmp.ne.s32.totalorder %s293_s20, %s1452_s29  ;;  %p1461_p6 = scmp.lt.s32.totalorder %s1452_s29, %s1452_s29 }
  0x1b   : > { %p1455_p1 = pnand %p1453_p0, %p1441_p9  ;;  %p1462_p5 = por %p1461_p6, %p1460_p4 }
  0x1d   : > { %p1456_p2 = pneg %p1455_p1 }
  0x1f   : > { %p1463_p3 = pnand %p1462_p5, %p1456_p2 }
  0x21   : > { %1466 = shalt.err (!%p1463_p3)
}
  0x22   : > { %s1512_s14 = smov 256   ;;  %s1513_s19 = smov 16  }
  0x23   : > { %1376 = dma.hbm_to_vmem [thread:$0]  (!%p1616_p7), %s1882_s5, 8192, %s293_s20, [#allocation4], %s1512_s14, %s1512_s14, %s1513_s19  }
  0x24   : > { %p1893_p8 = scmp.ne.s32.totalorder %s1890_s17, 0 }
  0x25   : > { %p1894_p10 = scmp.ne.s32.totalorder (!%p1893_p8), %s1891_s18, 0 }
  0x26   : > { %334 = sbr.rel (%p1893_p8) target bundleno = 967 (0x3c7), region = 56 }
  0x2d   : > { %1488 = dma.done.wait (%p1894_p10), [#allocation4], 8192  }
  0x2e   : > { %1490 = vsyncadd (%p1894_p10), [#allocation4], 4294959104  ;;  %p377_p3 = scmp.lt.s32.totalorder %s1497_s10, 1  ;;  %p379_p5 = scmp.lt.s32.totalorder %s1493_s30, 1 }
  0x2f   : > { %p393_p9 = scmp.eq.s32.totalorder %s1493_s30, 0 }
  0x30   : > { %s1906_s10 = smov (!%p377_p3, %s1497_s10), 1  ;;  %v1514_v0 = vmov (%p393_p9), -inf  }
  0x31   : > { %s380_s17 = scalar_select %p379_p5, %s1493_s30, 1 }
  0x32   : > { %s1174_s20 = sshll.u32 %s1906_s10, 4  ;;  %s392_s25 = scalar_lea.vmem %s1886_s9, %s1906_s10  ;;  %399 = vst [vmem:[#allocation2] sm:$0x3] (%p393_p9), %v1514_v0 }
  0x33   : > { %s1173_s18 = sshll.u32 %s380_s17, 3  ;;  %398 = sbr.rel (!%p393_p9) target bundleno = 58 (0x3a), region = 64 }
  0x34   : > { %s386_s26 = sadd.s32 %s1174_s20, %s1173_s18 }
  0x35   : > { %s1175_s27 = sshll.u32 %s386_s26, 3 }
  0x36   : > { %s1657_s14 = scalar_lea.vmem %s1877_s0, %s1175_s27 }
  0x3a PF: > { %v400_v1 = vld [vmem:[%s1657_s14] sm:$0xff]  ;;  %v1515_v2 = vmov 1   ;;  %v1516_v3 = vmov 0   ;;  %v401_v5 = vld [vmem:[%s1657_s14 + $0x8] sm:$0xff]  ;;  %v402_v7 = vld [vmem:[%s1657_s14 + $0x10] sm:$0xff]  ;;  %v1517_v8 = vmov 2   ;;  %v449_v18 = vlaneseq }
  0x3b   : > { %1428 = vset.pattern.permute.xlu1 %v1515_v2  ;;  %1427 = vset.pattern.permute.xlu0 %v1516_v3  ;;  %v404_v4 = vld [vmem:[%s1657_s14 + $0x20] sm:$0xff]  ;;  %v405_v6 = vld [vmem:[%s1657_s14 + $0x28] sm:$0xff]  ;;  %v406_v9 = vld [vmem:[%s1657_s14 + $0x30] sm:$0xff]  ;;  %vm599_vm0 = vcmask 261120   ;;  %p746_p7 = scmp.eq.s32.totalorder %s1493_s30, 1  ;;  %s742_s22 = scalar_lea.vmem [#allocation2], %s1493_s30 }
  0x3c   : > { %462 = vperm.xlu1 %1428, %v400_v1   ;;  %411 = vperm.xlu0 %1427, %v400_v1   ;;  %v588_v10 = vld [vmem:[%s1880_s3] sm:$0xff]  ;;  %v589_v11 = vld [vmem:[%s1880_s3 + $0x8] sm:$0xff]  ;;  %v403_v13 = vld [vmem:[%s1657_s14 + $0x18] sm:$0xff]  ;;  %v1679_v21 = vshrl.u32 %v449_v18, 7 }
  0x3d   : > { %v1259_v12 = vpack.c.bf16 %v589_v11, %v588_v10  ;;  %v590_v14 = vld [vmem:[%s1880_s3 + $0x10] sm:$0xff]  ;;  %v591_v15 = vld [vmem:[%s1880_s3 + $0x18] sm:$0xff]  ;;  %v408_v27 = vld [vmem:[%s1878_s1] sm:$0x7] }
  0x3e   : > { %v1263_v16 = vpack.c.bf16 %v591_v15, %v590_v14  ;;  %v407_v17 = vld [vmem:[%s1657_s14 + $0x38] sm:$0xff]  ;;  %v495_v24 = vsub.s32 1, %v1679_v21  ;;  %v451_v25 = vsub.s32 0, %v1679_v21  ;;  %v547_v32 = vsub.s32 2, %v1679_v21  ;;  %v1705_v44 = vld [vmem:[%s1879_s2] ss:$0 sm:$0xff] }
  0x3f   : > { %1260 = vmatprep.subr.bf16.mxu0 %v1259_v12  ;;  %1363 = vmatprep.subr.bf16.mxu1 %v1259_v12 }
  0x40   : > { %478 = vperm.xlu1 %1428, %v404_v4   ;;  %431 = vperm.xlu0 %1427, %v404_v4   ;;  %v1688_v29 = vrot.slane %v408_v27, %v495_v24  ;;  %v1692_v30 = vrot.slane %v408_v27, %v451_v25  ;;  %v1697_v36 = vrot.slane %v408_v27, %v547_v32 }
  0x41   : > { %1262 = vmatpush3.bf16.msra.mxu0 %v1259_v12  ;;  %1365 = vmatpush3.bf16.msra.mxu1 %v1259_v12 }
  0x42   : > { %1264 = vmatprep.subr.bf16.mxu0 %v1263_v16  ;;  %1364 = vmatprep.subr.bf16.mxu1 %v1263_v16 }
  0x44   : > { %1429 = vset.pattern.permute.xlu1 %v1516_v3  ;;  %416 = vperm.xlu0 %1427, %v401_v5  }
  0x45   : > { %436 = vperm.xlu1 %1429, %v405_v6   ;;  %1266 = vmatpush3.bf16.msra.mxu0 %v1263_v16 }
  0x46   : > { %1366 = vmatpush3.bf16.msra.mxu1 %v1263_v16 }
  0x48   : > { %421 = vperm.xlu0 %1427, %v402_v7  }
  0x49   : > { %1430 = vset.pattern.permute.xlu1 %v1515_v2 }
  0x4a   : > { %482 = vperm.xlu1 %1430, %v405_v6  }
  0x4c   : > { %1432 = vset.pattern.permute.xlu0 %v1515_v2 }
  0x4d   : > { %466 = vperm.xlu0 %1432, %v401_v5  }
  0x4e   : > { %1431 = vset.pattern.permute.xlu1 %v1517_v8 }
  0x4f   : > { %514 = vperm.xlu1 %1431, %v400_v1  }
  0x51   : > { %486 = vperm.xlu0 %1432, %v406_v9  }
  0x53   : > { %518 = vperm.xlu1 %1431, %v401_v5  }
  0x55   : > { %474 = vperm.xlu0 %1432, %v403_v13  }
  0x57   : > { %534 = vperm.xlu1 %1431, %v405_v6  }
  0x59   : > { %1436 = vset.pattern.permute.xlu0 %v1517_v8 }
  0x5a   : > { %530 = vperm.xlu0 %1436, %v404_v4  }
  0x5b   : > { %1433 = vset.pattern.permute.xlu1 %v1516_v3 }
  0x5c   : > { %441 = vperm.xlu1 %1433, %v406_v9  }
  0x5e   : > { %522 = vperm.xlu0 %1436, %v402_v7  }
  0x60   : > { %1434 = vset.pattern.permute.xlu1 %v1515_v2 }
  0x61   : > { %470 = vperm.xlu1 %1434, %v402_v7  }
  0x62   : > { %542 = vperm.xlu0 %1436, %v407_v17  }
  0x65   : > { %1435 = vset.pattern.permute.xlu1 %v1516_v3 }
  0x66   : > { %426 = vperm.xlu1 %1435, %v403_v13  }
  0x6a   : > { %446 = vperm.xlu1 %1435, %v407_v17  }
  0x6e   : > { %1437 = vset.pattern.permute.xlu1 %v1515_v2 }
  0x6f   : > { %490 = vperm.xlu1 %1437, %v407_v17  }
  0x73   : > { %1438 = vset.pattern.permute.xlu1 %v1517_v8 }
  0x74   : > { %538 = vperm.xlu1 %1438, %v406_v9  }
  0x78   : > { %526 = vperm.xlu1 %1438, %v403_v13  }
  0xbb   : > { %v463_v19 = vpop.permute.xlu1 %462  ;;  %v412_v20 = vpop.permute.xlu0 %411 }
  0xbc   : > { %v497_v34 = vmul.f32 %v1688_v29, %v463_v19  ;;  %v453_v35 = vmul.f32 %v1692_v30, %v412_v20 }
  0xbe   : > { %v505_v41 = vadd.f32 %v497_v34, %v453_v35 }
  0xbf   : > { %v479_v22 = vpop.permute.xlu1 %478  ;;  %v432_v23 = vpop.permute.xlu0 %431 }
  0xc0   : > { %v501_v55 = vmul.f32 %v1688_v29, %v479_v22  ;;  %v457_v56 = vmul.f32 %v1692_v30, %v432_v23 }
  0xc2   : > { %v509_v0 = vadd.f32 %v501_v55, %v457_v56 }
  0xc3   : > { %v417_v26 = vpop.permute.xlu0 %416 }
  0xc4   : > { %v437_v28 = vpop.permute.xlu1 %436  ;;  %v454_v38 = vmul.f32 %v1692_v30, %v417_v26 }
  0xc5   : > { %v458_v52 = vmul.f32 %v1692_v30, %v437_v28 }
  0xc7   : > { %v422_v31 = vpop.permute.xlu0 %421 }
  0xc8   : > { %v455_v9 = vmul.f32 %v1692_v30, %v422_v31 }
  0xc9   : > { %v483_v33 = vpop.permute.xlu1 %482 }
  0xca   : > { %v502_v48 = vmul.f32 %v1688_v29, %v483_v33 }
  0xcc   : > { %v467_v37 = vpop.permute.xlu0 %466  ;;  %v510_v58 = vadd.f32 %v502_v48, %v458_v52 }
  0xcd   : > { %v498_v39 = vmul.f32 %v1688_v29, %v467_v37 }
  0xce   : > { %v515_v40 = vpop.permute.xlu1 %514 }
  0xcf   : > { %v549_v42 = vmul.f32 %v1697_v36, %v515_v40  ;;  %v506_v45 = vadd.f32 %v498_v39, %v454_v38 }
  0xd0   : > { %v487_v43 = vpop.permute.xlu0 %486 }
  0xd1   : > { %v557_v46 = vadd.f32 %v549_v42, %v505_v41  ;;  %v503_v27 = vmul.f32 %v1688_v29, %v487_v43 }
  0xd2   : > { %v519_v47 = vpop.permute.xlu1 %518 }
  0xd3   : > { %v550_v49 = vmul.f32 %v1697_v36, %v519_v47  ;;  %v572_v50 = vadd.f32 %v1705_v44, %v557_v46 }
  0xd4   : > { %v475_v51 = vpop.permute.xlu0 %474 }
  0xd5   : > { %v558_v53 = vadd.f32 %v550_v49, %v506_v45  ;;  %v580_v54 = vmax.f32 %v572_v50, 0.0  ;;  %v500_v38 = vmul.f32 %v1688_v29, %v475_v51  ;;  %v1178_v51 = vld [vmem:[%s1881_s4] ss:$0 sm:$0xff] }
  0xd6   : > { %v535_v57 = vpop.permute.xlu1 %534 }
  0xd7   : > { %v573_v59 = vadd.f32 %v1705_v44, %v558_v53  ;;  %v554_v60 = vmul.f32 %v1697_v36, %v535_v57  ;;  %1247 = vmatprep.mubr.msk.f32.mxu0 %vm599_vm0, %v580_v54 }
  0xd9   : > { %v581_v61 = vmax.f32 %v573_v59, 0.0  ;;  %v562_v62 = vadd.f32 %v554_v60, %v510_v58  ;;  %v531_v63 = vpop.permute.xlu0 %530 }
  0xda   : > { %v553_v1 = vmul.f32 %v1697_v36, %v531_v63 }
  0xdb   : > { %v442_v2 = vpop.permute.xlu1 %441  ;;  %1248 = vmatmul.mubr.msk.f32.vlgmr.msra.gmra.mrb[0].mxu0 %vm599_vm0, %v581_v61  ;;  %v577_v4 = vadd.f32 %v1705_v44, %v562_v62 }
  0xdc   : > { %v561_v3 = vadd.f32 %v553_v1, %v509_v0  ;;  %v459_v28 = vmul.f32 %v1692_v30, %v442_v2 }
  0xdd   : > { %v523_v6 = vpop.permute.xlu0 %522  ;;  %v585_v10 = vmax.f32 %v577_v4, 0.0 }
  0xde   : > { %v576_v5 = vadd.f32 %v1705_v44, %v561_v3  ;;  %v551_v12 = vmul.f32 %v1697_v36, %v523_v6  ;;  %v511_v34 = vadd.f32 %v503_v27, %v459_v28  ;;  %v789_v28 = vld [vmem:[#allocation3 + $0x120] sm:$0xff] (%p746_p7) }
  0xe0   : > { %v471_v7 = vpop.permute.xlu1 %470  ;;  %v584_v8 = vmax.f32 %v576_v5, 0.0 }
  0xe1   : > { %v499_v11 = vmul.f32 %v1688_v29, %v471_v7  ;;  %v543_v19 = vpop.permute.xlu0 %542 }
  0xe2   : > { %1253 = vmatprep.mubr.msk.f32.mxu1 %vm599_vm0, %v584_v8  ;;  %v556_v26 = vmul.f32 %v1697_v36, %v543_v19  ;;  %v787_v19 = vld [vmem:[#allocation3 + $0x110] sm:$0xff] (%p746_p7) }
  0xe3   : > { %v507_v13 = vadd.f32 %v499_v11, %v455_v9  ;;  %1254 = vmatmul.mubr.msk.f32.vlgmr.msra.gmra.mrb[0].mxu1 %vm599_vm0, %v585_v10 }
  0xe5   : > { %v559_v14 = vadd.f32 %v551_v12, %v507_v13  ;;  %v427_v15 = vpop.permute.xlu1 %426  ;;  %v743_v12 = vld [vmem:[%s742_s22] sm:$0x1] }
  0xe6   : > { %v456_v35 = vmul.f32 %v1692_v30, %v427_v15  ;;  %v786_v15 = vld [vmem:[#allocation3 + $0x108] sm:$0xff] (%p746_p7) }
  0xe7   : > { %v574_v16 = vadd.f32 %v1705_v44, %v559_v14 }
  0xe8   : > { %v508_v42 = vadd.f32 %v500_v38, %v456_v35  ;;  %v795_v38 = vld [vmem:[#allocation3 + $0x150] sm:$0xff] (%p746_p7) }
  0xe9   : > { %v582_v17 = vmax.f32 %v574_v16, 0.0  ;;  %v447_v18 = vpop.permute.xlu1 %446  ;;  %v788_v16 = vld [vmem:[#allocation3 + $0x118] sm:$0xff] (%p746_p7) }
  0xea   : > { %v460_v22 = vmul.f32 %v1692_v30, %v447_v18  ;;  %v1267_v18 = vpack.c.bf16 (%p746_p7), %v788_v16, %v786_v15  ;;  %v754_v15 = vld [vmem:[#allocation3 + $0x8] sm:$0xff] (%p746_p7)  ;;  %v756_v16 = vld [vmem:[#allocation3 + $0x18] sm:$0xff] (%p746_p7) }
  0xeb   : > { %1250 = vmatprep.mubr.msk.f32.mxu0 %vm599_vm0, %v582_v17  ;;  %v785_v17 = vld [vmem:[#allocation3 + $0x100] sm:$0xff] (%p746_p7) }
  0xec   : > { %1268 = vmatprep.subr.bf16.mxu0 (%p746_p7), %v1267_v18 }
  0xee   : > { %v491_v20 = vpop.permute.xlu1 %490 }
  0xef   : > { %v504_v23 = vmul.f32 %v1688_v29, %v491_v20  ;;  %v790_v20 = vld [vmem:[#allocation3 + $0x128] sm:$0xff] (%p746_p7) }
  0xf1   : > { %v512_v31 = vadd.f32 %v504_v23, %v460_v22  ;;  %v792_v22 = vld [vmem:[#allocation3 + $0x138] sm:$0xff] (%p746_p7)  ;;  %v1518_v23 = vmov (%p746_p7), 0.0  }
  0xf2   : > { %v1271_v27 = vpack.c.bf16 (%p746_p7), %v792_v22, %v790_v20  ;;  %v980_v20 = vld [vmem:[%s1884_s7 + $0x28] sm:$0xff] (%p746_p7) }
  0xf3   : > { %v564_v32 = vadd.f32 %v556_v26, %v512_v31  ;;  %v539_v33 = vpop.permute.xlu1 %538  ;;  %v1269_v26 = vpack.c.bf16 (%p746_p7), %v787_v19, %v785_v17  ;;  %v791_v31 = vld [vmem:[#allocation3 + $0x130] sm:$0xff] (%p746_p7)  ;;  %v979_v19 = vld [vmem:[%s1884_s7 + $0x20] sm:$0xff] (%p746_p7) }
  0xf4   : > { %v555_v37 = vmul.f32 %v1697_v36, %v539_v33  ;;  %v796_v33 = vld [vmem:[#allocation3 + $0x158] sm:$0xff] (%p746_p7) }
  0xf5   : > { %v579_v40 = vadd.f32 %v1705_v44, %v564_v32  ;;  %v794_v32 = vld [vmem:[#allocation3 + $0x148] sm:$0xff] (%p746_p7)  ;;  %1270 = vmatpush1.bf16.msra.mxu0 (%p746_p7), %v1269_v26 }
  0xf6   : > { %v563_v39 = vadd.f32 %v555_v37, %v511_v34  ;;  %v1273_v34 = vpack.c.bf16 (%p746_p7), %v791_v31, %v789_v28  ;;  %1272 = vmatprep.subr.bf16.mxu0 (%p746_p7), %v1271_v27  ;;  %v1275_v35 = vpack.c.bf16 (%p746_p7), %v796_v33, %v794_v32  ;;  %v793_v37 = vld [vmem:[#allocation3 + $0x140] sm:$0xff] (%p746_p7)  ;;  %v997_v26 = vld [vmem:[%s1884_s7 + $0xb0] sm:$0xff] (%p746_p7)  ;;  %v998_v27 = vld [vmem:[%s1884_s7 + $0xb8] sm:$0xff] (%p746_p7)  ;;  %v1299_v28 = vpack.c.bf16 (%p746_p7), %v756_v16, %v754_v15 }
  0xf7   : > { %v527_v41 = vpop.permute.xlu1 %526  ;;  %v587_v48 = vmax.f32 %v579_v40, 0.0  ;;  %v800_v40 = vld [vmem:[#allocation3 + $0x178] sm:$0xff] (%p746_p7)  ;;  %v753_v31 = vld [vmem:[#allocation3] sm:$0xff] (%p746_p7)  ;;  %v755_v32 = vld [vmem:[#allocation3 + $0x10] sm:$0xff] (%p746_p7) }
  0xf8   : > { %v578_v43 = vadd.f32 %v1705_v44, %v563_v39  ;;  %v552_v45 = vmul.f32 %v1697_v36, %v527_v41  ;;  %v798_v39 = vld [vmem:[#allocation3 + $0x168] sm:$0xff] (%p746_p7)  ;;  %v1277_v41 = vpack.c.bf16 (%p746_p7), %v795_v38, %v793_v37  ;;  %v1343_v37 = vpack.c.bf16 (%p746_p7), %v998_v27, %v997_v26  ;;  %v773_v15 = vld [vmem:[#allocation3 + $0xa0] sm:$0xff] (%p746_p7)  ;;  %v775_v16 = vld [vmem:[#allocation3 + $0xb0] sm:$0xff] (%p746_p7) }
  0xf9   : > { %1274 = vmatpush1.bf16.msra.mxu0 (%p746_p7), %v1273_v34  ;;  %v758_v33 = vld [vmem:[#allocation3 + $0x28] sm:$0xff] (%p746_p7)  ;;  %v760_v34 = vld [vmem:[#allocation3 + $0x38] sm:$0xff] (%p746_p7)  ;;  %v779_v26 = vld [vmem:[#allocation3 + $0xd0] sm:$0xff] (%p746_p7) }
  0xfa   : > { %v586_v46 = vmax.f32 %v578_v43, 0.0  ;;  %v560_v47 = vadd.f32 %v552_v45, %v508_v42  ;;  %1276 = vmatprep.subr.bf16.mxu0 (%p746_p7), %v1275_v35  ;;  %v1279_v42 = vpack.c.bf16 (%p746_p7), %v800_v40, %v798_v39  ;;  %v797_v43 = vld [vmem:[#allocation3 + $0x160] sm:$0xff] (%p746_p7)  ;;  %v799_v45 = vld [vmem:[#allocation3 + $0x170] sm:$0xff] (%p746_p7)  ;;  %v1341_v35 = vpack.c.bf16 (%p746_p7), %v980_v20, %v979_v19  ;;  %v782_v27 = vld [vmem:[#allocation3 + $0xe8] sm:$0xff] (%p746_p7) }
  0xfb   : > { %v981_v38 = vld [vmem:[%s1884_s7 + $0x30] sm:$0xff] (%p746_p7)  ;;  %v982_v39 = vld [vmem:[%s1884_s7 + $0x38] sm:$0xff] (%p746_p7)  ;;  %v1321_v19 = vpack.c.bf16 (%p746_p7), %v775_v16, %v773_v15 }
  0xfc   : > { %v575_v49 = vadd.f32 %v1705_v44, %v560_v47  ;;  %1256 = vmatprep.mubr.msk.f32.mxu1 %vm599_vm0, %v586_v46  ;;  %v802_v46 = vld [vmem:[#allocation3 + $0x188] sm:$0xff] (%p746_p7)  ;;  %v804_v47 = vld [vmem:[#allocation3 + $0x198] sm:$0xff] (%p746_p7) }
  0xfd   : > { %1257 = vmatmul.mubr.msk.f32.gmra.mrb[2].mxu1 %vm599_vm0, %v587_v48  ;;  %1278 = vmatpush1.bf16.msra.mxu0 (%p746_p7), %v1277_v41  ;;  %v1281_v48 = vpack.c.bf16 (%p746_p7), %v799_v45, %v797_v43  ;;  %v1301_v41 = vpack.c.bf16 (%p746_p7), %v755_v32, %v753_v31  ;;  %v1000_v43 = vld [vmem:[%s1884_s7 + $0xc8] sm:$0xff] (%p746_p7)  ;;  %v1303_v45 = vpack.c.bf16 (%p746_p7), %v760_v34, %v758_v33  ;;  %v783_v34 = vld [vmem:[#allocation3 + $0xf0] sm:$0xff] (%p746_p7) }
  0xfe   : > { %v583_v30 = vmax.f32 %v575_v49, 0.0  ;;  %1280 = vmatprep.subr.bf16.mxu0 (%p746_p7), %v1279_v42  ;;  %v1283_v49 = vpack.c.bf16 (%p746_p7), %v804_v47, %v802_v46  ;;  %v999_v42 = vld [vmem:[%s1884_s7 + $0xc0] sm:$0xff] (%p746_p7)  ;;  %v759_v47 = vld [vmem:[#allocation3 + $0x30] sm:$0xff] (%p746_p7) }
  0xff   : > { %v757_v46 = vld [vmem:[#allocation3 + $0x20] sm:$0xff] (%p746_p7) }
 0x100   : > { %1251 = vmatmul.mubr.msk.f32.gmra.mrb[2].mxu0 %vm599_vm0, %v583_v30  ;;  %v801_v30 = vld [vmem:[#allocation3 + $0x180] sm:$0xff] (%p746_p7) }
 0x101   : > { %881 = vmatprep.mubr.f32.mxu0 (%p746_p7), %v1518_v23  ;;  %1282 = vmatpush1.bf16.msra.mxu0 (%p746_p7), %v1281_v48  ;;  %v762_v48 = vld [vmem:[#allocation3 + $0x48] sm:$0xff] (%p746_p7)  ;;  %v781_v33 = vld [vmem:[#allocation3 + $0xe0] sm:$0xff] (%p746_p7) }
 0x102   : > { %1284 = vmatprep.subr.bf16.mxu0 (%p746_p7), %v1283_v49  ;;  %v764_v49 = vld [vmem:[#allocation3 + $0x58] sm:$0xff] (%p746_p7) }
 0x1ae   : > { %v1249_v29 = vpop.f32.mrb[0].mxu0 }
 0x1af   : > { %v690_v50 = vpop.f32.mrb[1].mxu0  ;;  %v696_v52 = vadd.f32 %v1249_v29, %v1178_v51  ;;  %v803_v29 = vld [vmem:[#allocation3 + $0x190] sm:$0xff] (%p746_p7) }
 0x1b0   : > { %v691_v55 = vadd.f32 %v1178_v51, %v690_v50  ;;  %v806_v50 = vld [vmem:[#allocation3 + $0x1a8] sm:$0xff] (%p746_p7) }
 0x1b6   : > { %v1255_v36 = vpop.f32.mrb[0].mxu1 }
 0x1b7   : > { %v716_v53 = vadd.f32 %v1255_v36, %v1178_v51  ;;  %v710_v54 = vpop.f32.mrb[1].mxu1  ;;  %v1285_v36 = vpack.c.bf16 (%p746_p7), %v803_v29, %v801_v30  ;;  %v1345_v30 = vpack.c.bf16 (%p746_p7), %v982_v39, %v981_v38  ;;  %v1347_v29 = vpack.c.bf16 (%p746_p7), %v1000_v43, %v999_v42  ;;  %v987_v38 = vld [vmem:[%s1884_s7 + $0x60] sm:$0xff] (%p746_p7)  ;;  %v988_v39 = vld [vmem:[%s1884_s7 + $0x68] sm:$0xff] (%p746_p7)  ;;  %v1006_v42 = vld [vmem:[%s1884_s7 + $0xf8] sm:$0xff] (%p746_p7) }
 0x1b8   : > { %v711_v44 = vadd.f32 %v1178_v51, %v710_v54  ;;  %v807_v54 = vld [vmem:[#allocation3 + $0x1b0] sm:$0xff] (%p746_p7) }
 0x1b9   : > { %v730_v56 = vmax.f32 %v696_v52, %v716_v53  ;;  %v805_v53 = vld [vmem:[#allocation3 + $0x1a0] sm:$0xff] (%p746_p7)  ;;  %1286 = vmatpush1.bf16.msra.mxu0 (%p746_p7), %v1285_v36  ;;  %v1305_v36 = vpack.c.bf16 (%p746_p7), %v759_v47, %v757_v46  ;;  %v990_v46 = vld [vmem:[%s1884_s7 + $0x78] sm:$0xff] (%p746_p7) }
 0x1ba   : > { %v729_v57 = vmax.f32 %v691_v55, %v711_v44  ;;  %v810_v55 = vld [vmem:[#allocation3 + $0x1c8] sm:$0xff] (%p746_p7)  ;;  %v812_v44 = vld [vmem:[#allocation3 + $0x1d8] sm:$0xff] (%p746_p7) }
 0x1bc   : > { %v733_v58 = vmax.f32 %v729_v57, %v730_v56  ;;  %v1289_v56 = vpack.c.bf16 (%p746_p7), %v807_v54, %v805_v53  ;;  %v809_v57 = vld [vmem:[#allocation3 + $0x1c0] sm:$0xff] (%p746_p7)  ;;  %v1002_v53 = vld [vmem:[%s1884_s7 + $0xd8] sm:$0xff] (%p746_p7)  ;;  %v1307_v54 = vpack.c.bf16 (%p746_p7), %v764_v49, %v762_v48  ;;  %v959_v48 = vld [vmem:[%s1883_s6] sm:$0x3] (%p746_p7) }
 0x1bd   : > { %v964_v49 = vrot.slane (%p746_p7), %v959_v48, %v451_v25 }
 0x1d0   : > { %v1258_v59 = vpop.f32.mrb[2].mxu1 }
 0x1d1   : > { %v720_v60 = vpop.f32.mrb[3].mxu1  ;;  %v726_v62 = vadd.f32 %v1258_v59, %v1178_v51  ;;  %v811_v59 = vld [vmem:[#allocation3 + $0x1d0] sm:$0xff] (%p746_p7) }
 0x1d2   : > { %v721_v1 = vadd.f32 %v1178_v51, %v720_v60  ;;  %v814_v60 = vld [vmem:[#allocation3 + $0x1e8] sm:$0xff] (%p746_p7) }
 0x1d3   : > { %v1252_v61 = vpop.f32.mrb[2].mxu0 }
 0x1d4   : > { %v706_v63 = vadd.f32 %v1252_v61, %v1178_v51  ;;  %v700_v0 = vpop.f32.mrb[3].mxu0  ;;  %v816_v61 = vld [vmem:[#allocation3 + $0x1f8] sm:$0xff] (%p746_p7) }
 0x1d5   : > { %v701_v2 = vadd.f32 %v1178_v51, %v700_v0  ;;  %v808_v51 = vld [vmem:[#allocation3 + $0x1b8] sm:$0xff] (%p746_p7) }
 0x1d6   : > { %v732_v3 = vmax.f32 %v706_v63, %v726_v62  ;;  %v1287_v52 = vpack.c.bf16 (%p746_p7), %v808_v51, %v806_v50  ;;  %v991_v62 = vld [vmem:[%s1884_s7 + $0x80] sm:$0xff] (%p746_p7)  ;;  %v992_v63 = vld [vmem:[%s1884_s7 + $0x88] sm:$0xff] (%p746_p7) }
 0x1d7   : > { %v731_v4 = vmax.f32 %v701_v2, %v721_v1  ;;  %v975_v0 = vld [vmem:[%s1884_s7] sm:$0xff] (%p746_p7)  ;;  %v1331_v1 = vpack.c.bf16 (%p746_p7), %v992_v63, %v991_v62  ;;  %v976_v2 = vld [vmem:[%s1884_s7 + $0x8] sm:$0xff] (%p746_p7) }
 0x1d8   : > { %1288 = vmatprep.subr.bf16.mxu0 (%p746_p7), %v1287_v52  ;;  %v983_v50 = vld [vmem:[%s1884_s7 + $0x40] sm:$0xff] (%p746_p7)  ;;  %v984_v51 = vld [vmem:[%s1884_s7 + $0x48] sm:$0xff] (%p746_p7)  ;;  %v1001_v52 = vld [vmem:[%s1884_s7 + $0xd0] sm:$0xff] (%p746_p7) }
 0x1d9   : > { %v734_v5 = vmax.f32 %v731_v4, %v732_v3  ;;  %v993_v3 = vld [vmem:[%s1884_s7 + $0x90] sm:$0xff] (%p746_p7)  ;;  %v994_v4 = vld [vmem:[%s1884_s7 + $0x98] sm:$0xff] (%p746_p7)  ;;  %1290 = vmatpush1.bf16.msra.mxu0 (%p746_p7), %v1289_v56  ;;  %1332 = vmatprep.subr.bf16.mxu1 (%p746_p7), %v1331_v1  ;;  %v1003_v62 = vld [vmem:[%s1884_s7 + $0xe0] sm:$0xff] (%p746_p7) }
 0x1da   : > { %v766_v56 = vld [vmem:[#allocation3 + $0x68] sm:$0xff] (%p746_p7)  ;;  %v765_v1 = vld [vmem:[#allocation3 + $0x60] sm:$0xff] (%p746_p7) }
 0x1db   : > { %v735_v6 = vmax.f32 %v733_v58, %v734_v5  ;;  %v1291_v58 = vpack.c.bf16 (%p746_p7), %v812_v44, %v810_v55  ;;  %v1293_v5 = vpack.c.bf16 (%p746_p7), %v811_v59, %v809_v57  ;;  %v761_v55 = vld [vmem:[#allocation3 + $0x40] sm:$0xff] (%p746_p7)  ;;  %v763_v44 = vld [vmem:[#allocation3 + $0x50] sm:$0xff] (%p746_p7)  ;;  %v768_v57 = vld [vmem:[#allocation3 + $0x78] sm:$0xff] (%p746_p7)  ;;  %v1351_v59 = vpack.c.bf16 (%p746_p7), %v1002_v53, %v1001_v52 }
 0x1dc   : > { %v1004_v63 = vld [vmem:[%s1884_s7 + $0xe8] sm:$0xff] (%p746_p7) }
 0x1dd   : > { %v736_v7 = vrot.slane %v735_v6, 4  ;;  %1292 = vmatprep.subr.bf16.mxu0 (%p746_p7), %v1291_v58  ;;  %v1349_v58 = vpack.c.bf16 (%p746_p7), %v984_v51, %v983_v50 }
 0x1de   : > { %1294 = vmatpush1.bf16.msra.mxu0 (%p746_p7), %v1293_v5 }
 0x1df   : > { %v737_v8 = vmax.f32 %v735_v6, %v736_v7  ;;  %v1333_v6 = vpack.c.bf16 (%p746_p7), %v976_v2, %v975_v0  ;;  %v1335_v7 = vpack.c.bf16 (%p746_p7), %v994_v4, %v993_v3  ;;  %v1311_v0 = vpack.c.bf16 (%p746_p7), %v768_v57, %v766_v56  ;;  %v767_v2 = vld [vmem:[#allocation3 + $0x70] sm:$0xff] (%p746_p7)  ;;  %v770_v3 = vld [vmem:[#allocation3 + $0x88] sm:$0xff] (%p746_p7)  ;;  %v772_v4 = vld [vmem:[#allocation3 + $0x98] sm:$0xff] (%p746_p7) }
 0x1e1   : > { %v738_v9 = vrot.slane %v737_v8, 2  ;;  %1334 = vmatpush3.bf16.msra.mxu1 (%p746_p7), %v1333_v6  ;;  %v1355_v6 = vpack.c.bf16 (%p746_p7), %v1004_v63, %v1003_v62 }
 0x1e2   : > { %1336 = vmatprep.subr.bf16.mxu1 (%p746_p7), %v1335_v7  ;;  %v1313_v7 = vpack.c.bf16 (%p746_p7), %v767_v2, %v765_v1 }
 0x1e3   : > { %v739_v10 = vmax.f32 %v737_v8, %v738_v9  ;;  %v977_v8 = vld [vmem:[%s1884_s7 + $0x10] sm:$0xff] (%p746_p7)  ;;  %v978_v9 = vld [vmem:[%s1884_s7 + $0x18] sm:$0xff] (%p746_p7) }
 0x1e4   : > { %v1337_v17 = vpack.c.bf16 (%p746_p7), %v978_v9, %v977_v8  ;;  %v1315_v8 = vpack.c.bf16 (%p746_p7), %v772_v4, %v770_v3  ;;  %v769_v9 = vld [vmem:[#allocation3 + $0x80] sm:$0xff] (%p746_p7) }
 0x1e5   : > { %v740_v11 = vrot.slane %v739_v10, 1  ;;  %750 = sbr.rel (!%p746_p7) target bundleno = 967 (0x3c7), region = 68 }
 0x1e6   : > { %1338 = vmatpush3.bf16.msra.mxu1 (%p746_p7), %v1337_v17  ;;  %v778_v17 = vld [vmem:[#allocation3 + $0xc8] sm:$0xff] (%p746_p7) }
 0x1e7   : > { %v741_v13 = vmax.f32 %v739_v10, %v740_v11  ;;  %v995_v10 = vld [vmem:[%s1884_s7 + $0xa0] sm:$0xff] (%p746_p7)  ;;  %v1295_v11 = vpack.c.bf16 (%p746_p7), %v816_v61, %v814_v60  ;;  %v986_v60 = vld [vmem:[%s1884_s7 + $0x58] sm:$0xff] (%p746_p7)  ;;  %v1309_v61 = vpack.c.bf16 (%p746_p7), %v763_v44, %v761_v55 }
 0x1e8   : > { %v1007_v55 = vld [vmem:[%s1885_s8] sm:$0x1] (%p746_p7) }
 0x1e9   : > { %v744_v14 = vmax.f32 %v743_v12, %v741_v13  ;;  %v813_v12 = vld [vmem:[#allocation3 + $0x1e0] sm:$0xff] (%p746_p7)  ;;  %v815_v13 = vld [vmem:[#allocation3 + $0x1f0] sm:$0xff] (%p746_p7)  ;;  %1296 = vmatprep.subr.bf16.mxu0 (%p746_p7), %v1295_v11  ;;  %v774_v11 = vld [vmem:[#allocation3 + $0xa8] sm:$0xff] (%p746_p7) }
 0x1ea   : > { %v1297_v22 = vpack.c.bf16 (%p746_p7), %v815_v13, %v813_v12  ;;  %v776_v12 = vld [vmem:[#allocation3 + $0xb8] sm:$0xff] (%p746_p7) }
 0x1eb   : > { %745 = vst [vmem:[%s742_s22] sm:$0x1] %v744_v14  ;;  %v996_v14 = vld [vmem:[%s1884_s7 + $0xa8] sm:$0xff] (%p746_p7) }
 0x1ec   : > { %v1339_v18 = vpack.c.bf16 %v996_v14, %v995_v10  ;;  %1298 = vmatpush1.bf16.msra.mxu0 %v1297_v22  ;;  %v771_v10 = vld [vmem:[#allocation3 + $0x90] sm:$0xff]  ;;  %v1319_v14 = vpack.c.bf16 %v776_v12, %v774_v11  ;;  %v777_v22 = vld [vmem:[#allocation3 + $0xc0] sm:$0xff] }
 0x1ed   : > { %1300 = vmatprep.subr.bf16.mxu0 %v1299_v28  ;;  %v1317_v13 = vpack.c.bf16 %v771_v10, %v769_v9  ;;  %v784_v28 = vld [vmem:[#allocation3 + $0xf8] sm:$0xff]  ;;  %v1325_v31 = vpack.c.bf16 %v779_v26, %v777_v22 }
 0x1ee   : > { %1340 = vmatprep.subr.bf16.mxu1 %v1339_v18  ;;  %v780_v18 = vld [vmem:[#allocation3 + $0xd8] sm:$0xff]  ;;  %v1327_v32 = vpack.c.bf16 %v784_v28, %v782_v27 }
 0x1ef   : > { %1342 = vmatpush3.bf16.msra.mxu1 %v1341_v35  ;;  %v1323_v20 = vpack.c.bf16 %v780_v18, %v778_v17  ;;  %v1329_v35 = vpack.c.bf16 %v783_v34, %v781_v33 }
 0x1f0   : > { %1344 = vmatprep.subr.bf16.mxu1 %v1343_v37 }
 0x1f2   : > { %v752_v40 = vld [vmem:[#allocation2 + $0x1] sm:$0x1]  ;;  %v751_v37 = vld [vmem:[#allocation2] sm:$0x1] }
 0x1f3   : > { %882 = vmatmul.mubr.f32.vlgmr.msra.gmra.mrb[0].mxu0 %v752_v40  ;;  %1346 = vmatpush3.bf16.msra.mxu1 %v1345_v30  ;;  %v1357_v40 = vpack.c.bf16 %v988_v39, %v987_v38  ;;  %v968_v30 = vrot.slane %v959_v48, %v495_v24 }
 0x1f4   : > { %1302 = vmatpush1.bf16.msra.mxu0 %v1301_v41  ;;  %952 = vmatprep.mubr.f32.mxu0 %v1518_v23  ;;  %v985_v23 = vld [vmem:[%s1884_s7 + $0x50] sm:$0xff] }
 0x1f5   : > { %1304 = vmatprep.subr.bf16.mxu0 %v1303_v45  ;;  %1348 = vmatprep.subr.bf16.mxu1 %v1347_v29  ;;  %v1353_v5 = vpack.c.bf16 %v986_v60, %v985_v23  ;;  %v1005_v41 = vld [vmem:[%s1884_s7 + $0xf0] sm:$0xff] }
 0x1f6   : > { %v1359_v43 = vpack.c.bf16 %v1006_v42, %v1005_v41  ;;  %v989_v45 = vld [vmem:[%s1884_s7 + $0x70] sm:$0xff] }
 0x1f7   : > { %1350 = vmatpush3.bf16.msra.mxu1 %v1349_v58  ;;  %v1361_v47 = vpack.c.bf16 %v990_v46, %v989_v45 }
 0x1f8   : > { %1306 = vmatpush1.bf16.msra.mxu0 %v1305_v36  ;;  %1352 = vmatprep.subr.bf16.mxu1 %v1351_v59 }
 0x1f9   : > { %1308 = vmatprep.subr.bf16.mxu0 %v1307_v54 }
 0x1fb   : > { %1354 = vmatpush3.bf16.msra.mxu1 %v1353_v5 }
 0x1fc   : > { %1310 = vmatpush1.bf16.msra.mxu0 %v1309_v61  ;;  %1356 = vmatprep.subr.bf16.mxu1 %v1355_v6 }
 0x1fd   : > { %1312 = vmatprep.subr.bf16.mxu0 %v1311_v0 }
 0x1ff   : > { %1358 = vmatpush3.bf16.msra.mxu1 %v1357_v40 }
 0x200   : > { %1314 = vmatpush1.bf16.msra.mxu0 %v1313_v7  ;;  %1360 = vmatprep.subr.bf16.mxu1 %v1359_v43 }
 0x201   : > { %1316 = vmatprep.subr.bf16.mxu0 %v1315_v8 }
 0x203   : > { %1362 = vmatpush3.bf16.msra.mxu1 %v1361_v47 }
 0x204   : > { %1318 = vmatpush1.bf16.msra.mxu0 %v1317_v13 }
 0x205   : > { %1320 = vmatprep.subr.bf16.mxu0 %v1319_v14 }
 0x208   : > { %1322 = vmatpush1.bf16.msra.mxu0 %v1321_v19 }
 0x209   : > { %1324 = vmatprep.subr.bf16.mxu0 %v1323_v20 }
 0x20c   : > { %1326 = vmatpush1.bf16.msra.mxu0 %v1325_v31 }
 0x20d   : > { %1328 = vmatprep.subr.bf16.mxu0 %v1327_v32 }
 0x210   : > { %1330 = vmatpush1.bf16.msra.mxu0 %v1329_v35 }
 0x213   : > { %953 = vmatmul.mubr.f32.vlgmr.msra.gmra.mrb[0].mxu0 %v751_v37 }
 0x2e6   : > { %v954_v29 = vpop.f32.mrb[0].mxu0 }
 0x2e7   : > { %v971_v50 = vadd.f32 %v964_v49, %v954_v29  ;;  %v956_v51 = vpop.f32.mrb[1].mxu0 }
 0x2e8   : > { %v972_v36 = vadd.f32 %v968_v30, %v956_v51 }
 0x2e9   : > { %v973_v53 = vmax.f32 %v971_v50, 0.0 }
 0x2ea   : > { %v974_v52 = vmax.f32 %v972_v36, 0.0 }
 0x2ec   : > { %1072 = vmatprep.mubr.f32.mxu1 %v974_v52 }
 0x2ed   : > { %1073 = vmatmul.mubr.f32.vlgmr.msra.gmra.mrb[0].mxu1 %v973_v53 }
 0x3c0   : > { %v1236_v54 = vpop.f32.mrb[0].mxu1 }
 0x3c1   : > { %v1237_v44 = vpop.f32.mrb[1].mxu1 }
 0x3c2   : > { %v1238_v56 = vadd.f32 %v1237_v44, %v1236_v54 }
 0x3c4   : > { %v1075_v57 = vadd.f32 %v1238_v56, %v1007_v55 }
 0x3c6   : > { %1078 = vst [vmem:[%s392_s25] sm:$0x1] %v1075_v57 }
 0x3c7 PF: > { %s20_s13 = sadd.s32 1, %s1509_s13   ;;  %s1895_s30 = smov %s1501_s11 }
 0x3c8   : > { %p17_p11 = scmp.ge.s32.totalorder %s20_s13, 6   ;;  %s1896_s10 = smov %s1505_s12 }
 0x3c9   : > { %s1897_s11 = smov %s1900_s15  ;;  %s1898_s12 = smov %s1904_s16 }
 0x3ca   :  { %19 = sbr.rel (!%p17_p11) target bundleno = 3 (0x3), region = 100 }
 0x3d1   :  { %1096 = vsyncpa [#allocation4], 1 }
 0x3d2   :  { %1098 = vsyncpa [#allocation4 + $0x1], 1 }

</bundles_post_ra>
